<compile_context>
chip_gen: v7x
topology: tpu7x:2x2x1
jax: 0.10.0
libtpu: 0.0.40
codegen_flags: <defaults>
</compile_context>

<pallas_src>
import functools

import jax
import jax.numpy as jnp
from jax.experimental import pallas as pl
from jax.experimental.pallas import tpu as pltpu


def _round_up(x, m):
    return (x + m - 1) // m * m


def mlp_kernel(x_ref, w1_ref, b1_ref, w2_ref, b2_ref, o_ref):
    # x_ref:  (TM, K_pad)  compute dtype     w1_ref: (K_pad, H_pad) compute dtype
    # b1_ref: (1, H_pad)   f32               w2_ref: (H_pad, N_pad) compute dtype
    # b2_ref: (1, N_pad)   f32               o_ref:  (TM, N_pad)    f32
    h = jnp.dot(x_ref[...], w1_ref[...], preferred_element_type=jnp.float32)
    h = jnp.maximum(h + b1_ref[...], 0.0)  # bias + ReLU fused in-kernel (VPU, f32)
    out = jnp.dot(h.astype(w2_ref.dtype), w2_ref[...], preferred_element_type=jnp.float32)
    o_ref[...] = (out + b2_ref[...]).astype(o_ref.dtype)


def prepare_params(w1, b1, w2, b2, *, compute_dtype=jnp.bfloat16):
    """One-time conversion of PyTorch-layout params to the kernel layout.

    w1: (latent, in), b1: (latent,), w2: (out, latent), b2: (out,)   [nn.Linear layout]
    Returns (w1_p, b1_p, w2_p, b2_p, input_size, output_size) with weights transposed to
    (in, out), zero-padded to multiples of 128, cast to `compute_dtype`; biases stay f32.
    Zero padding keeps the math exact (padded rows/cols contribute 0; padded outputs sliced off).
    """
    latent_size, input_size = w1.shape
    output_size = w2.shape[0]
    k_pad = _round_up(input_size, 128)
    h_pad = _round_up(latent_size, 128)
    n_pad = _round_up(output_size, 128)

    w1_p = jnp.zeros((k_pad, h_pad), compute_dtype)
    w1_p = w1_p.at[:input_size, :latent_size].set(w1.T.astype(compute_dtype))
    w2_p = jnp.zeros((h_pad, n_pad), compute_dtype)
    w2_p = w2_p.at[:latent_size, :output_size].set(w2.T.astype(compute_dtype))
    b1_p = jnp.zeros((1, h_pad), jnp.float32).at[0, :latent_size].set(b1.astype(jnp.float32))
    b2_p = jnp.zeros((1, n_pad), jnp.float32).at[0, :output_size].set(b2.astype(jnp.float32))
    return w1_p, b1_p, w2_p, b2_p, int(input_size), int(output_size)


@functools.partial(jax.jit, static_argnames=("input_size", "output_size", "tm"))
def _forward_impl(x2d, w1_p, b1_p, w2_p, b2_p, *, input_size, output_size, tm):
    B = x2d.shape[0]
    k_pad, h_pad = w1_p.shape
    n_pad = w2_p.shape[1]
    compute_dtype = w1_p.dtype

    # Batch tile: 256 rows keeps the MXU busy; for tiny batches use a smaller 8-aligned tile so
    # the block equals the (padded) array extent.
    tm_eff = min(tm, _round_up(B, 8))
    b_pad = _round_up(B, tm_eff)
    grid = (b_pad // tm_eff,)

    # Pad x once per call (lane-dense K, sublane-aligned batch).
    x_p = jnp.zeros((b_pad, k_pad), compute_dtype)
    x_p = x_p.at[:B, :input_size].set(x2d.astype(compute_dtype))

    # Explicit VMEM budget: resident weights/biases + double-buffered x/out tiles + h temporary.
    itemsize = jnp.dtype(compute_dtype).itemsize
    est = (k_pad * h_pad + h_pad * n_pad) * itemsize      # resident weights
    est += (h_pad + n_pad) * 4                            # biases
    est += 2 * tm_eff * k_pad * itemsize                  # x double buffer
    est += 2 * tm_eff * n_pad * 4                         # out double buffer
    est += tm_eff * h_pad * 4                             # hidden temporary
    vmem_limit = int(min(max(2 * est, 8 * 1024 * 1024), 48 * 1024 * 1024))

    out_p = pl.pallas_call(
        mlp_kernel,
        out_shape=jax.ShapeDtypeStruct((b_pad, n_pad), jnp.float32),
        grid=grid,
        in_specs=[
            pl.BlockSpec((tm_eff, k_pad), lambda i: (i, 0)),   # x tile (pipelined over batch)
            pl.BlockSpec((k_pad, h_pad), lambda i: (0, 0)),    # w1 resident
            pl.BlockSpec((1, h_pad), lambda i: (0, 0)),        # b1 resident
            pl.BlockSpec((h_pad, n_pad), lambda i: (0, 0)),    # w2 resident
            pl.BlockSpec((1, n_pad), lambda i: (0, 0)),        # b2 resident
        ],
        out_specs=pl.BlockSpec((tm_eff, n_pad), lambda i: (i, 0)),
        compiler_params=pltpu.CompilerParams(
            dimension_semantics=("parallel",),
            vmem_limit_bytes=vmem_limit,
        ),
    )(x_p, w1_p, b1_p, w2_p, b2_p)

    return out_p[:B, :output_size]


def simple_regression_forward(x, params, *, tm=256):
    """x: (..., input_size). params: output of prepare_params. Returns (..., output_size) f32."""
    w1_p, b1_p, w2_p, b2_p, input_size, output_size = params
    lead = x.shape[:-1]
    x2d = x.reshape(-1, x.shape[-1])
    out = _forward_impl(x2d, w1_p, b1_p, w2_p, b2_p,
                        input_size=input_size, output_size=output_size, tm=tm)
    return out.reshape(*lead, output_size)


def init_params(key, input_size, latent_size, output_size):
    """PyTorch nn.Linear default init (uniform +/- 1/sqrt(fan_in)), PyTorch (out, in) layout."""
    k1, k2, k3, k4 = jax.random.split(key, 4)
    bound1 = 1.0 / jnp.sqrt(float(input_size))
    bound2 = 1.0 / jnp.sqrt(float(latent_size))
    w1 = jax.random.uniform(k1, (latent_size, input_size), jnp.float32, -bound1, bound1)
    b1 = jax.random.uniform(k2, (latent_size,), jnp.float32, -bound1, bound1)
    w2 = jax.random.uniform(k3, (output_size, latent_size), jnp.float32, -bound2, bound2)
    b2 = jax.random.uniform(k4, (output_size,), jnp.float32, -bound2, bound2)
    return w1, b1, w2, b2


if __name__ == "__main__":
    input_size, latent_size, output_size = 48, 96, 12
    batch = 4

    key = jax.random.PRNGKey(0)
    k_params, k_x = jax.random.split(key)
    w1, b1, w2, b2 = init_params(k_params, input_size, latent_size, output_size)
    x = jax.random.normal(k_x, (batch, input_size), dtype=jnp.float32)

    # Reference: PyTorch forward semantics in plain JAX f32.
    ref = jnp.maximum(x @ w1.T + b1, 0.0) @ w2.T + b2

    # Exactness check with the f32 compute path.
    params_f32 = prepare_params(w1, b1, w2, b2, compute_dtype=jnp.float32)
    out_f32 = jax.block_until_ready(simple_regression_forward(x, params_f32))
    assert out_f32.shape == (batch, output_size)
    assert jnp.allclose(out_f32, ref, atol=1e-4, rtol=1e-4)

    # Optimized bf16 fast path (v6e/v7x MXU peak); looser tolerance for bf16 rounding.
    params_bf16 = prepare_params(w1, b1, w2, b2, compute_dtype=jnp.bfloat16)
    out_bf16 = jax.block_until_ready(simple_regression_forward(x, params_bf16))
    assert out_bf16.shape == (batch, output_size)
    assert jnp.allclose(out_bf16, ref, atol=5e-2, rtol=5e-2)

    print("KERNEL_OK")
</pallas_src>

<mosaic_0001>
module attributes {stable_mosaic.version = 11 : i64} {
  func.func @mlp_kernel(%arg0: i32, %arg1: memref<8x128xf32, #tpu.memory_space<vmem>>, %arg2: memref<128x128xf32, #tpu.memory_space<vmem>>, %arg3: memref<1x128xf32, #tpu.memory_space<vmem>>, %arg4: memref<128x128xf32, #tpu.memory_space<vmem>>, %arg5: memref<1x128xf32, #tpu.memory_space<vmem>>, %arg6: memref<8x128xf32, #tpu.memory_space<vmem>>) attributes {dimension_semantics = [#tpu.dimension_semantics<parallel>], iteration_bounds = array<i64: 1>, scalar_prefetch = 0 : i64, scratch_operands = 0 : i64, tpu.core_type = #tpu.core_type<tc>, window_params = [{transform_indices = @transform_0, window_bounds = array<i64: 8, 128>}, {pipeline_mode = #tpu.pipeline_mode<synchronous>, transform_indices = @transform_1, window_bounds = array<i64: 128, 128>}, {pipeline_mode = #tpu.pipeline_mode<synchronous>, transform_indices = @transform_2, window_bounds = array<i64: 1, 128>}, {pipeline_mode = #tpu.pipeline_mode<synchronous>, transform_indices = @transform_3, window_bounds = array<i64: 128, 128>}, {pipeline_mode = #tpu.pipeline_mode<synchronous>, transform_indices = @transform_4, window_bounds = array<i64: 1, 128>}, {transform_indices = @transform_5, window_bounds = array<i64: 8, 128>}]} {
    %c0 = arith.constant 0 : index
    %c0_0 = arith.constant 0 : index
    %0 = vector.load %arg1[%c0, %c0_0] : memref<8x128xf32, #tpu.memory_space<vmem>>, vector<8x128xf32>
    %c0_1 = arith.constant 0 : index
    %c0_2 = arith.constant 0 : index
    %1 = vector.load %arg2[%c0_1, %c0_2] : memref<128x128xf32, #tpu.memory_space<vmem>>, vector<128x128xf32>
    %cst = arith.constant dense<0.000000e+00> : vector<8x128xf32>
    %2 = tpu.matmul %0, %1, %cst {dimension_numbers = #tpu.dot_dimension_numbers<[1], [0], [0], [1], [0, 0, 1, 1], [], []>} : vector<8x128xf32>, vector<128x128xf32>, vector<8x128xf32> -> vector<8x128xf32>
    %c0_3 = arith.constant 0 : index
    %c0_4 = arith.constant 0 : index
    %3 = vector.load %arg3[%c0_3, %c0_4] : memref<1x128xf32, #tpu.memory_space<vmem>>, vector<1x128xf32>
    %4 = vector.broadcast %3 : vector<1x128xf32> to vector<8x128xf32>
    %5 = arith.addf %2, %4 : vector<8x128xf32>
    %cst_5 = arith.constant 0.000000e+00 : f32
    %6 = vector.broadcast %cst_5 : f32 to vector<8x128xf32>
    %7 = arith.maximumf %5, %6 : vector<8x128xf32>
    %c0_6 = arith.constant 0 : index
    %c0_7 = arith.constant 0 : index
    %8 = vector.load %arg4[%c0_6, %c0_7] : memref<128x128xf32, #tpu.memory_space<vmem>>, vector<128x128xf32>
    %cst_8 = arith.constant dense<0.000000e+00> : vector<8x128xf32>
    %9 = tpu.matmul %7, %8, %cst_8 {dimension_numbers = #tpu.dot_dimension_numbers<[1], [0], [0], [1], [0, 0, 1, 1], [], []>} : vector<8x128xf32>, vector<128x128xf32>, vector<8x128xf32> -> vector<8x128xf32>
    %c0_9 = arith.constant 0 : index
    %c0_10 = arith.constant 0 : index
    %10 = vector.load %arg5[%c0_9, %c0_10] : memref<1x128xf32, #tpu.memory_space<vmem>>, vector<1x128xf32>
    %11 = vector.broadcast %10 : vector<1x128xf32> to vector<8x128xf32>
    %12 = arith.addf %9, %11 : vector<8x128xf32>
    %c0_11 = arith.constant 0 : index
    %c0_12 = arith.constant 0 : index
    %13 = vector.load %arg6[%c0_11, %c0_12] : memref<8x128xf32, #tpu.memory_space<vmem>>, vector<8x128xf32>
    tpu.vector_store %arg6[%c0_11, %c0_12], %12 {strides = array<i32>} : memref<8x128xf32, #tpu.memory_space<vmem>>, vector<8x128xf32>,
    return
  }
  func.func @transform_0(%arg0: i32) -> (i32, i32) {
    %c0_i32 = arith.constant 0 : i32
    %c0_i32_0 = arith.constant 0 : i32
    return %arg0, %c0_i32 : i32, i32
  }
  func.func @transform_1(%arg0: i32) -> (i32, i32) {
    %c0_i32 = arith.constant 0 : i32
    %c0_i32_0 = arith.constant 0 : i32
    %c0_i32_1 = arith.constant 0 : i32
    return %c0_i32, %c0_i32_0 : i32, i32
  }
  func.func @transform_2(%arg0: i32) -> (i32, i32) {
    %c0_i32 = arith.constant 0 : i32
    %c0_i32_0 = arith.constant 0 : i32
    %c0_i32_1 = arith.constant 0 : i32
    return %c0_i32, %c0_i32_0 : i32, i32
  }
  func.func @transform_3(%arg0: i32) -> (i32, i32) {
    %c0_i32 = arith.constant 0 : i32
    %c0_i32_0 = arith.constant 0 : i32
    %c0_i32_1 = arith.constant 0 : i32
    return %c0_i32, %c0_i32_0 : i32, i32
  }
  func.func @transform_4(%arg0: i32) -> (i32, i32) {
    %c0_i32 = arith.constant 0 : i32
    %c0_i32_0 = arith.constant 0 : i32
    %c0_i32_1 = arith.constant 0 : i32
    return %c0_i32, %c0_i32_0 : i32, i32
  }
  func.func @transform_5(%arg0: i32) -> (i32, i32) {
    %c0_i32 = arith.constant 0 : i32
    %c0_i32_0 = arith.constant 0 : i32
    return %arg0, %c0_i32 : i32, i32
  }
}

</mosaic_0001>

<bundles_post_ra>
// kernel: _forward_impl.1
= control target key start
LH: loop header
LB: loop body
LE: loop exit
PB: predicated region body
PF: predicated region fallthrough
CT: control target
= control target key end

     0   :  { %10 = vsyncpa [#allocation3], 0  ;;  %s541_s0 = inlined_call_operand.vmem [shape: f32[8,128], index: 0, kind: input, shape index: {}]   ;;  %s542_s1 = inlined_call_operand.hbm [shape: f32[128,128], index: 1, kind: input, shape index: {}]   ;;  %s543_s2 = inlined_call_operand.vmem [shape: f32[1,128], index: 2, kind: input, shape index: {}]   ;;  %s544_s3 = inlined_call_operand.hbm [shape: f32[128,128], index: 3, kind: input, shape index: {}]   ;;  %s545_s4 = inlined_call_operand.vmem [shape: f32[1,128], index: 4, kind: input, shape index: {}]   ;;  %s546_s5 = inlined_call_operand.vmem [shape: f32[8,128], index: 5, kind: output, shape index: {}]  }
   0x1   :  { %11 = vsyncpa [#allocation5], 0  ;;  %s452_s18 = smov [#allocation2]   ;;  %s404_s22 = scalar_lea.hbm %s542_s1, 2048 }
   0x2   :  { %s19_s19 = sshll.u32 %s452_s18, 4  ;;  %p405_p0 = scmp.ne.s32.totalorder %s542_s1, %s404_s22  ;;  %s20_s19 = int_to_ptr.vmem [resolvable:$true] %s19_s19 }
   0x3   :  { %p408_p1 = scmp.lt.u32.totalorder %s404_s22, %s542_s1 }
   0x5   :  { %p410_p2 = pnand %p408_p1, %p405_p0 }
   0x7   :  { %413 = shalt.err (!%p410_p2)
}
   0x8   :  { %s414_s27 = scalar_lea.vmem %s20_s19, 2048  ;;  %p419_p4 = scmp.lt.s32.totalorder %s20_s19, %s20_s19 }
   0x9   :  { %p415_p3 = scmp.ne.s32.totalorder %s20_s19, %s414_s27  ;;  %p420_p5 = scmp.lt.s32.totalorder %s414_s27, %s414_s27 }
   0xb   :  { %p421_p6 = por %p420_p5, %p419_p4 }
   0xd   :  { %p422_p7 = pnand %p421_p6, %p415_p3 }
   0xf   :  { %425 = shalt.err (!%p422_p7)
}
  0x10   :  { %s453_s28 = smov 128   ;;  %s454_s29 = smov 8  }
  0x11   :  { %25 = dma.hbm_to_vmem [thread:$0]  %s542_s1, 2048, %s20_s19, [#allocation3], %s453_s28, %s453_s28, %s454_s29  }
  0x12   :  { %s455_s7 = smov [#allocation4]   ;;  %s426_s11 = scalar_lea.hbm %s544_s3, 2048 }
  0x13   :  { %s33_s8 = sshll.u32 %s455_s7, 4  ;;  %p427_p8 = scmp.ne.s32.totalorder %s544_s3, %s426_s11  ;;  %s34_s8 = int_to_ptr.vmem [resolvable:$true] %s33_s8 }
  0x14   :  { %p430_p9 = scmp.lt.u32.totalorder %s426_s11, %s544_s3 }
  0x16   :  { %p432_p10 = pnand %p430_p9, %p427_p8 }
  0x18   :  { %435 = shalt.err (!%p432_p10)
}
  0x19   :  { %s436_s16 = scalar_lea.vmem %s34_s8, 2048  ;;  %p441_p12 = scmp.lt.s32.totalorder %s34_s8, %s34_s8 }
  0x1a   :  { %p437_p11 = scmp.ne.s32.totalorder %s34_s8, %s436_s16  ;;  %p442_p13 = scmp.lt.s32.totalorder %s436_s16, %s436_s16 }
  0x1c   :  { %p443_p0 = por %p442_p13, %p441_p12 }
  0x1e   :  { %p444_p1 = pnand %p443_p0, %p437_p11 }
  0x20   :  { %447 = shalt.err (!%p444_p1)
}
  0x21   :  { %39 = dma.hbm_to_vmem [thread:$0]  %s544_s3, 2048, %s34_s8, [#allocation5], %s453_s28, %s453_s28, %s454_s29  }
  0x22   :  { %448 = dma.done.wait [#allocation3], 2048  }
  0x23   :  { %449 = vsyncadd [#allocation3], 4294965248 }
  0x24   :  { %450 = dma.done.wait [#allocation5], 2048  }
  0x25   :  { %451 = vsyncadd [#allocation5], 4294965248  ;;  %v456_v0 = vmov 0.0|0.0   ;;  %vm457_vm0 = vmmov 0   ;;  %v458_v1 = vmov 0.0   ;;  %v49_v2 = vld [vmem:[#allocation2] sm:$0xff] }
  0x26   :  { %349 = vmatprep.subr.bf16.mxu0 %v456_v0  ;;  %311 = vmatprep.mubr.msk.f32.mxu0 %vm457_vm0, %v458_v1  ;;  %v50_v3 = vld [vmem:[#allocation2 + $0x8] sm:$0xff]  ;;  %v51_v4 = vld [vmem:[#allocation2 + $0x10] sm:$0xff]  ;;  %v52_v6 = vld [vmem:[#allocation2 + $0x18] sm:$0xff] }
  0x27   :  { %373 = vmatprep.subr.bf16.mxu1 %v456_v0  ;;  %346 = vmatprep.mubr.msk.f32.mxu1 %vm457_vm0, %v458_v1  ;;  %v350_v5 = vpack.c.bf16 %v50_v3, %v49_v2  ;;  %v353_v7 = vpack.c.bf16 %v52_v6, %v51_v4  ;;  %v53_v8 = vld [vmem:[#allocation2 + $0x20] sm:$0xff]  ;;  %v54_v9 = vld [vmem:[#allocation2 + $0x28] sm:$0xff]  ;;  %v145_v12 = vld [vmem:[#allocation4 + $0x10] sm:$0xff] }
  0x28   :  { %v143_v10 = vld [vmem:[#allocation4] sm:$0xff]  ;;  %v144_v11 = vld [vmem:[#allocation4 + $0x8] sm:$0xff]  ;;  %v146_v13 = vld [vmem:[#allocation4 + $0x18] sm:$0xff]  ;;  %v356_v14 = vpack.c.bf16 %v54_v9, %v53_v8 }
  0x29   :  { %351 = vmatpush3.bf16.msra.mxu0 %v350_v5  ;;  %v374_v15 = vpack.c.bf16 %v144_v11, %v143_v10  ;;  %v55_v16 = vld [vmem:[#allocation2 + $0x30] sm:$0xff]  ;;  %v56_v17 = vld [vmem:[#allocation2 + $0x38] sm:$0xff]  ;;  %v377_v18 = vpack.c.bf16 %v146_v13, %v145_v12  ;;  %v147_v19 = vld [vmem:[#allocation4 + $0x20] sm:$0xff] }
  0x2a   :  { %352 = vmatprep.subr.bf16.mxu0 %v456_v0  ;;  %v148_v20 = vld [vmem:[#allocation4 + $0x28] sm:$0xff]  ;;  %v359_v21 = vpack.c.bf16 %v56_v17, %v55_v16  ;;  %v57_v22 = vld [vmem:[#allocation2 + $0x40] sm:$0xff]  ;;  %v149_v25 = vld [vmem:[#allocation4 + $0x30] sm:$0xff] }
  0x2b   :  { %375 = vmatpush3.bf16.msra.mxu1 %v374_v15  ;;  %v58_v23 = vld [vmem:[#allocation2 + $0x48] sm:$0xff]  ;;  %v380_v24 = vpack.c.bf16 %v148_v20, %v147_v19  ;;  %v150_v26 = vld [vmem:[#allocation4 + $0x38] sm:$0xff]  ;;  %v59_v28 = vld [vmem:[#allocation2 + $0x50] sm:$0xff] }
  0x2c   :  { %376 = vmatprep.subr.bf16.mxu1 %v456_v0  ;;  %v362_v27 = vpack.c.bf16 %v58_v23, %v57_v22  ;;  %v60_v29 = vld [vmem:[#allocation2 + $0x58] sm:$0xff]  ;;  %v383_v30 = vpack.c.bf16 %v150_v26, %v149_v25  ;;  %v151_v31 = vld [vmem:[#allocation4 + $0x40] sm:$0xff]  ;;  %v152_v32 = vld [vmem:[#allocation4 + $0x48] sm:$0xff] }
  0x2d   :  { %354 = vmatpush3.bf16.msra.mxu0 %v353_v7  ;;  %v365_v33 = vpack.c.bf16 %v60_v29, %v59_v28  ;;  %v61_v34 = vld [vmem:[#allocation2 + $0x60] sm:$0xff]  ;;  %v62_v35 = vld [vmem:[#allocation2 + $0x68] sm:$0xff]  ;;  %v386_v36 = vpack.c.bf16 %v152_v32, %v151_v31  ;;  %v153_v37 = vld [vmem:[#allocation4 + $0x50] sm:$0xff] }
  0x2e   :  { %355 = vmatprep.subr.bf16.mxu0 %v456_v0  ;;  %v154_v38 = vld [vmem:[#allocation4 + $0x58] sm:$0xff]  ;;  %v368_v39 = vpack.c.bf16 %v62_v35, %v61_v34  ;;  %v63_v40 = vld [vmem:[#allocation2 + $0x70] sm:$0xff]  ;;  %v155_v43 = vld [vmem:[#allocation4 + $0x60] sm:$0xff] }
  0x2f   :  { %378 = vmatpush3.bf16.msra.mxu1 %v377_v18  ;;  %v64_v41 = vld [vmem:[#allocation2 + $0x78] sm:$0xff]  ;;  %v389_v42 = vpack.c.bf16 %v154_v38, %v153_v37  ;;  %v156_v44 = vld [vmem:[#allocation4 + $0x68] sm:$0xff]  ;;  %v48_v47 = vld [vmem:[%s541_s0] sm:$0xff] }
  0x30   :  { %379 = vmatprep.subr.bf16.mxu1 %v456_v0  ;;  %v371_v45 = vpack.c.bf16 %v64_v41, %v63_v40  ;;  %v392_v46 = vpack.c.bf16 %v156_v44, %v155_v43  ;;  %v157_v48 = vld [vmem:[#allocation4 + $0x70] sm:$0xff]  ;;  %v158_v49 = vld [vmem:[#allocation4 + $0x78] sm:$0xff]  ;;  %v243_v51 = vld [vmem:[%s543_s2] ss:$0 sm:$0xff] }
  0x31   :  { %357 = vmatpush3.bf16.msra.mxu0 %v356_v14  ;;  %v395_v50 = vpack.c.bf16 %v158_v49, %v157_v48  ;;  %v244_v56 = vld [vmem:[%s545_s4] ss:$0 sm:$0xff] }
  0x32   :  { %358 = vmatprep.subr.bf16.mxu0 %v456_v0 }
  0x33   :  { %381 = vmatpush3.bf16.msra.mxu1 %v380_v24 }
  0x34   :  { %382 = vmatprep.subr.bf16.mxu1 %v456_v0 }
  0x35   :  { %360 = vmatpush3.bf16.msra.mxu0 %v359_v21 }
  0x36   :  { %361 = vmatprep.subr.bf16.mxu0 %v456_v0 }
  0x37   :  { %384 = vmatpush3.bf16.msra.mxu1 %v383_v30 }
  0x38   :  { %385 = vmatprep.subr.bf16.mxu1 %v456_v0 }
  0x39   :  { %363 = vmatpush3.bf16.msra.mxu0 %v362_v27 }
  0x3a   :  { %364 = vmatprep.subr.bf16.mxu0 %v456_v0 }
  0x3b   :  { %387 = vmatpush3.bf16.msra.mxu1 %v386_v36 }
  0x3c   :  { %388 = vmatprep.subr.bf16.mxu1 %v456_v0 }
  0x3d   :  { %366 = vmatpush3.bf16.msra.mxu0 %v365_v33 }
  0x3e   :  { %367 = vmatprep.subr.bf16.mxu0 %v456_v0 }
  0x3f   :  { %390 = vmatpush3.bf16.msra.mxu1 %v389_v42 }
  0x40   :  { %391 = vmatprep.subr.bf16.mxu1 %v456_v0 }
  0x41   :  { %369 = vmatpush3.bf16.msra.mxu0 %v368_v39 }
  0x42   :  { %370 = vmatprep.subr.bf16.mxu0 %v456_v0 }
  0x43   :  { %393 = vmatpush3.bf16.msra.mxu1 %v392_v46 }
  0x44   :  { %394 = vmatprep.subr.bf16.mxu1 %v456_v0 }
  0x45   :  { %372 = vmatpush3.bf16.msra.mxu0 %v371_v45 }
  0x47   :  { %396 = vmatpush3.bf16.msra.mxu1 %v395_v50 }
  0x48   :  { %312 = vmatmul.mubr.f32.vlgmr.msra.gmra.mrb[0].mxu0 %v48_v47 }
 0x11b   :  { %v138_v52 = vpop.f32.mrb[0].mxu0 }
 0x11c   :  { %v139_v53 = vadd.f32 %v243_v51, %v138_v52  ;;  %v313_v54 = vpop.f32.mrb[1].mxu0 }
 0x11e   :  { %v142_v55 = vmax.f32 %v139_v53, 0.0 }
 0x120   :  { %347 = vmatmul.mubr.f32.vlgmr.msra.gmra.mrb[0].mxu1 %v142_v55 }
 0x1f3   :  { %v232_v57 = vpop.f32.mrb[0].mxu1 }
 0x1f4   :  { %v233_v58 = vadd.f32 %v244_v56, %v232_v57  ;;  %v348_v59 = vpop.f32.mrb[1].mxu1 }
 0x1f6   :  { %236 = vst [vmem:[%s546_s5] sm:$0xff] %v233_v58 }
 0x1f7   :  { %241 = vsyncpa [#allocation3], 1 }
 0x1f8   :  { %242 = vsyncpa [#allocation5], 1 }

</bundles_post_ra>
